<compile_context>
chip_gen: v6e
topology: v6e:2x2x1
jax: 0.10.0
libtpu: 0.0.40
codegen_flags: <defaults>
</compile_context>

<pallas_src>
import math

import jax
import jax.numpy as jnp
from jax.experimental import pallas as pl
from jax.experimental.pallas import tpu as pltpu


def _round_up(x, m):
    return ((x + m - 1) // m) * m


def _vmem_need_bytes(tm, d):
    # row+col operand tiles (double buffered) + ~3 (tm, tm) f32 temporaries
    # + vector accumulator + output blocks.
    return (2 * 2 * tm * (d + 2) * 4
            + 3 * tm * tm * 4
            + tm * 4
            + 2 * 2 * 8 * 128 * 4)


def _uniform_pair_sum_kernel(bi_ref, bj_ref, zr_ref, zc_ref, out_ref, acc_ref):
    p = pl.program_id(1)
    n_p = pl.num_programs(1)

    @pl.when(p == 0)
    def _init():
        acc_ref[...] = jnp.zeros_like(acc_ref)

    # arg[a, b] = 2t<z_a, z_b> - t||z_a||^2 - t||z_b||^2 = -t * ||z_a - z_b||^2.
    # Norm terms ride along as two extra operand columns (see wrapper), so this is a
    # single MXU contraction with no transpose and no per-element subtracts.
    arg = jax.lax.dot_general(
        zr_ref[...], zc_ref[...],
        dimension_numbers=(((1,), (1,)), ((), ())),
        preferred_element_type=jnp.float32)
    # True d2 >= 0 so arg <= 0; the clamp guards Gram-trick cancellation. Padded rows
    # carry -1e30 in the norm column, so their arg is hugely negative -> exp == 0.
    e = jnp.exp(jnp.minimum(arg, 0.0))

    # Upper-triangular block iteration: an off-diagonal block (i < j) stands for both
    # (i, j) and (j, i) -> weight 2. Diagonal blocks are counted once; their self-pair
    # entries (exp(0) ~= 1 for real rows, 0 for padded rows) are removed in the
    # wrapper by subtracting the scalar n.
    factor = jnp.where(bi_ref[p] == bj_ref[p], 1.0, 2.0).astype(jnp.float32)

    # Vector partial sums (sublane reduce only); the one cross-lane reduce is deferred
    # to the finalize step.
    acc_ref[...] += factor * jnp.sum(e, axis=0, keepdims=True)

    @pl.when(p == n_p - 1)
    def _finalize():
        total = jnp.sum(acc_ref[...], keepdims=True)           # (1, 1)
        out_ref[...] = jnp.broadcast_to(total, out_ref.shape)  # single lane-dense store


def uniform_score(zis, zjs, t=2.0, block=1024):
    """Pallas TPU implementation of Uniform_score.forward(zis, zjs, t)."""
    n, d = zis.shape
    assert zjs.shape == (n, d)
    t = float(t)

    # Stack both sides; pre-scale by sqrt(2t) so a tile matmul directly yields 2t<a,b>.
    z = jnp.stack([zis, zjs]).astype(jnp.float32)                 # (2, N, D)
    zss = z * jnp.float32(math.sqrt(2.0 * t))
    neg_tsq = -0.5 * jnp.sum(zss * zss, axis=-1, keepdims=True)   # (2, N, 1) = -t||z||^2

    # Tile size: one full block for small N, otherwise `block`, shrunk while the
    # per-step VMEM footprint exceeds ~40 MiB (keeps v7x's 64 MiB/core VMEM safe).
    tm = min(block, _round_up(n, 8))
    while tm > 128 and _vmem_need_bytes(tm, d) > 40 * 1024 * 1024:
        tm = max(128, _round_up(tm // 2, 128))
    npad = _round_up(n, tm)
    n_blk = npad // tm
    if n_blk > 1:
        assert tm % 128 == 0, "tiled path requires a 128-multiple block size"

    if npad > n:
        pad = npad - n
        zss = jnp.pad(zss, ((0, 0), (0, pad), (0, 0)))
        # Huge "norm" for padded rows -> their exp term underflows to exactly 0.
        neg_tsq = jnp.pad(neg_tsq, ((0, 0), (0, pad), (0, 0)),
                          constant_values=jnp.float32(-1e30))
    ones = jnp.ones((2, npad, 1), jnp.float32)
    # dot(z_row, z_col^T): last two columns contribute -t||a||^2 - t||b||^2.
    z_row = jnp.concatenate([zss, neg_tsq, ones], axis=-1)        # (2, npad, D+2)
    z_col = jnp.concatenate([zss, ones, neg_tsq], axis=-1)        # (2, npad, D+2)

    # Upper-triangular block pairs (i <= j), row-major so consecutive pairs share bi.
    bi_list, bj_list = [], []
    for i in range(n_blk):
        for j in range(i, n_blk):
            bi_list.append(i)
            bj_list.append(j)
    bi = jnp.asarray(bi_list, dtype=jnp.int32)
    bj = jnp.asarray(bj_list, dtype=jnp.int32)
    n_pairs = len(bi_list)

    vmem_limit = int(min(48 * 1024 * 1024,
                         max(32 * 1024 * 1024, 2 * _vmem_need_bytes(tm, d))))

    out = pl.pallas_call(
        _uniform_pair_sum_kernel,
        out_shape=jax.ShapeDtypeStruct((2, 8, 128), jnp.float32),
        grid_spec=pltpu.PrefetchScalarGridSpec(
            num_scalar_prefetch=2,
            grid=(2, n_pairs),
            in_specs=[
                # Row tile (reused across a whole row group of pairs).
                pl.BlockSpec((None, tm, d + 2),
                             lambda s, p, bi_ref, bj_ref: (s, bi_ref[p], 0)),
                # Column tile (streams).
                pl.BlockSpec((None, tm, d + 2),
                             lambda s, p, bi_ref, bj_ref: (s, bj_ref[p], 0)),
            ],
            out_specs=pl.BlockSpec((None, 8, 128),
                                   lambda s, p, bi_ref, bj_ref: (s, 0, 0)),
            scratch_shapes=[pltpu.VMEM((1, tm), jnp.float32)],
        ),
        compiler_params=pltpu.CompilerParams(
            dimension_semantics=("parallel", "arbitrary"),
            vmem_limit_bytes=vmem_limit,
        ),
    )(bi, bj, z_row, z_col)

    # out[s, 0, 0] = 2 * sum_{i<j} exp(-t d2) + (n real self-pairs, each exp(0)=1).
    total = out[:, 0, 0]                                           # (2,)
    pair_mean = (total - jnp.float32(n)) / jnp.float32(n * (n - 1))
    return jnp.mean(jnp.log(pair_mean))


def _reference(zis, zjs, t=2.0):
    # Pure-JAX reference mimicking torch.pdist(...).pow(2).mul(-t).exp().mean().log()
    def one(z):
        diff = z[:, None, :] - z[None, :, :]
        d2 = jnp.sum(diff * diff, axis=-1)
        nn = z.shape[0]
        iu = jnp.triu_indices(nn, k=1)
        vals = jnp.exp(-t * d2[iu])
        return jnp.log(jnp.mean(vals))

    return (one(zis) + one(zjs)) / 2.0


if __name__ == "__main__":
    key = jax.random.PRNGKey(0)
    k1, k2 = jax.random.split(key)

    # Small shapes consistent with the module: batch=8 samples, hidden=32 features.
    N, D = 8, 32
    zis = jax.random.normal(k1, (N, D), dtype=jnp.float32)
    zjs = jax.random.normal(k2, (N, D), dtype=jnp.float32)
    # L2-normalize (typical contrastive-embedding input; keeps exp() well-conditioned).
    zis = zis / jnp.linalg.norm(zis, axis=-1, keepdims=True)
    zjs = zjs / jnp.linalg.norm(zjs, axis=-1, keepdims=True)

    out = jax.block_until_ready(uniform_score(zis, zjs, t=2.0))
    ref = _reference(zis, zjs, t=2.0)
    assert jnp.allclose(out, ref, atol=1e-4, rtol=1e-4), (out, ref)

    # Multi-block / padded path: exercises upper-triangular block pairs, the 2x
    # off-diagonal weighting, and zero-contribution padding.
    k3, k4 = jax.random.split(k2)
    N2, D2 = 200, 64
    a = jax.random.normal(k3, (N2, D2), dtype=jnp.float32)
    b = jax.random.normal(k4, (N2, D2), dtype=jnp.float32)
    a = a / jnp.linalg.norm(a, axis=-1, keepdims=True)
    b = b / jnp.linalg.norm(b, axis=-1, keepdims=True)
    out2 = jax.block_until_ready(uniform_score(a, b, t=2.0, block=128))
    ref2 = _reference(a, b, t=2.0)
    assert jnp.allclose(out2, ref2, atol=1e-4, rtol=1e-4), (out2, ref2)

    print("KERNEL_OK")
</pallas_src>

<mosaic_0001>
module attributes {stable_mosaic.version = 11 : i64} {
  func.func @_uniform_pair_sum_kernel(%arg0: i32, %arg1: i32, %arg2: memref<1xi32, #tpu.memory_space<smem>>, %arg3: memref<1xi32, #tpu.memory_space<smem>>, %arg4: memref<1x8x34xf32, #tpu.memory_space<vmem>>, %arg5: memref<1x8x34xf32, #tpu.memory_space<vmem>>, %arg6: memref<1x8x128xf32, #tpu.memory_space<vmem>>, %arg7: memref<1x8xf32, #tpu.memory_space<vmem>>) attributes {dimension_semantics = [#tpu.dimension_semantics<parallel>, #tpu.dimension_semantics<arbitrary>], iteration_bounds = array<i64: 2, 1>, scalar_prefetch = 2 : i64, scratch_operands = 1 : i64, tpu.core_type = #tpu.core_type<tc>, window_params = [{transform_indices = @transform_0, window_bounds = array<i64: 1, 8, 34>}, {transform_indices = @transform_1, window_bounds = array<i64: 1, 8, 34>}, {transform_indices = @transform_2, window_bounds = array<i64: 1, 8, 128>}]} {
    %c0_i32 = arith.constant 0 : i32
    %0 = arith.cmpi eq, %arg1, %c0_i32 : i32
    %1 = arith.extui %0 : i1 to i32
    %c0_i32_0 = arith.constant 0 : i32
    %2 = arith.cmpi ne, %1, %c0_i32_0 : i32
    scf.if %2 {
      %cst_16 = arith.constant 0.000000e+00 : f32
      %27 = vector.broadcast %cst_16 : f32 to vector<1x8xf32>
      %c0_17 = arith.constant 0 : index
      %c0_18 = arith.constant 0 : index
      %28 = vector.load %arg7[%c0_17, %c0_18] : memref<1x8xf32, #tpu.memory_space<vmem>>, vector<1x8xf32>
      tpu.vector_store %arg7[%c0_17, %c0_18], %27 {strides = array<i32>} : memref<1x8xf32, #tpu.memory_space<vmem>>, vector<1x8xf32>,
    } else {
    }
    %c0 = arith.constant 0 : index
    %c0_1 = arith.constant 0 : index
    %c0_2 = arith.constant 0 : index
    %3 = vector.load %arg4[%c0, %c0_1, %c0_2] : memref<1x8x34xf32, #tpu.memory_space<vmem>>, vector<1x8x34xf32>
    %4 = vector.shape_cast %3 : vector<1x8x34xf32> to vector<8x34xf32>
    %c0_3 = arith.constant 0 : index
    %c0_4 = arith.constant 0 : index
    %c0_5 = arith.constant 0 : index
    %5 = vector.load %arg5[%c0_3, %c0_4, %c0_5] : memref<1x8x34xf32, #tpu.memory_space<vmem>>, vector<1x8x34xf32>
    %6 = vector.shape_cast %5 : vector<1x8x34xf32> to vector<8x34xf32>
    %cst = arith.constant dense<0.000000e+00> : vector<8x8xf32>
    %7 = tpu.matmul %4, %6, %cst {dimension_numbers = #tpu.dot_dimension_numbers<[1], [1], [0], [0], [0, 0, 1, 0], [], []>} : vector<8x34xf32>, vector<8x34xf32>, vector<8x8xf32> -> vector<8x8xf32>
    %cst_6 = arith.constant 0.000000e+00 : f32
    %8 = vector.broadcast %cst_6 : f32 to vector<8x8xf32>
    %9 = arith.minimumf %7, %8 : vector<8x8xf32>
    %10 = math.exp %9 : vector<8x8xf32>
    %11 = arith.index_cast %arg1 : i32 to index
    %12 = memref.load %arg2[%11] : memref<1xi32, #tpu.memory_space<smem>>
    %13 = arith.index_cast %arg1 : i32 to index
    %14 = memref.load %arg3[%13] : memref<1xi32, #tpu.memory_space<smem>>
    %15 = arith.cmpi eq, %12, %14 : i32
    %cst_7 = arith.constant 1.000000e+00 : f32
    %cst_8 = arith.constant 2.000000e+00 : f32
    %16 = arith.select %15, %cst_7, %cst_8 : f32
    %c0_9 = arith.constant 0 : index
    %c0_10 = arith.constant 0 : index
    %17 = vector.load %arg7[%c0_9, %c0_10] : memref<1x8xf32, #tpu.memory_space<vmem>>, vector<1x8xf32>
    %cst_11 = arith.constant dense<0.000000e+00> : vector<8xf32>
    %18 = vector.multi_reduction <add>, %10, %cst_11 [0] : vector<8x8xf32> to vector<8xf32>
    %19 = vector.shape_cast %18 : vector<8xf32> to vector<1x8xf32>
    %20 = vector.broadcast %16 : f32 to vector<1x8xf32>
    %21 = arith.mulf %20, %19 : vector<1x8xf32>
    %22 = arith.addf %17, %21 : vector<1x8xf32>
    %c0_12 = arith.constant 0 : index
    %c0_13 = arith.constant 0 : index
    %23 = vector.load %arg7[%c0_12, %c0_13] : memref<1x8xf32, #tpu.memory_space<vmem>>, vector<1x8xf32>
    tpu.vector_store %arg7[%c0_12, %c0_13], %22 {strides = array<i32>} : memref<1x8xf32, #tpu.memory_space<vmem>>, vector<1x8xf32>,
    %c0_i32_14 = arith.constant 0 : i32
    %24 = arith.cmpi eq, %arg1, %c0_i32_14 : i32
    %25 = arith.extui %24 : i1 to i32
    %c0_i32_15 = arith.constant 0 : i32
    %26 = arith.cmpi ne, %25, %c0_i32_15 : i32
    scf.if %26 {
      %c0_16 = arith.constant 0 : index
      %c0_17 = arith.constant 0 : index
      %27 = vector.load %arg7[%c0_16, %c0_17] : memref<1x8xf32, #tpu.memory_space<vmem>>, vector<1x8xf32>
      %28 = vector.shape_cast %27 : vector<1x8xf32> to vector<1x1x8xf32>
      %cst_18 = arith.constant dense<0.000000e+00> : vector<1xf32>
      %29 = vector.multi_reduction <add>, %28, %cst_18 [1, 2] : vector<1x1x8xf32> to vector<1xf32>
      %30 = vector.shape_cast %29 : vector<1xf32> to vector<1x1x1xf32>
      %31 = vector.extract %30[0, 0, 0] : f32 from vector<1x1x1xf32>
      %32 = vector.broadcast %31 : f32 to vector<1x1xf32>
      %33 = vector.shape_cast %32 : vector<1x1xf32> to vector<1x1xf32>
      %34 = vector.broadcast %33 : vector<1x1xf32> to vector<8x128xf32>
      %c0_19 = arith.constant 0 : index
      %c0_20 = arith.constant 0 : index
      %c0_21 = arith.constant 0 : index
      %35 = vector.load %arg6[%c0_19, %c0_20, %c0_21] : memref<1x8x128xf32, #tpu.memory_space<vmem>>, vector<1x8x128xf32>
      %36 = vector.shape_cast %35 : vector<1x8x128xf32> to vector<8x128xf32>
      %37 = vector.shape_cast %34 : vector<8x128xf32> to vector<1x8x128xf32>
      tpu.vector_store %arg6[%c0_19, %c0_20, %c0_21], %37 {strides = array<i32>} : memref<1x8x128xf32, #tpu.memory_space<vmem>>, vector<1x8x128xf32>,
    } else {
    }
    return
  }
  func.func @transform_0(%arg0: i32, %arg1: i32, %arg2: memref<1xi32, #tpu.memory_space<smem>>, %arg3: memref<1xi32, #tpu.memory_space<smem>>) -> (i32, i32, i32) {
    %0 = arith.index_cast %arg1 : i32 to index
    %1 = memref.load %arg2[%0] : memref<1xi32, #tpu.memory_space<smem>>
    %c0_i32 = arith.constant 0 : i32
    %c0_i32_0 = arith.constant 0 : i32
    return %arg0, %1, %c0_i32 : i32, i32, i32
  }
  func.func @transform_1(%arg0: i32, %arg1: i32, %arg2: memref<1xi32, #tpu.memory_space<smem>>, %arg3: memref<1xi32, #tpu.memory_space<smem>>) -> (i32, i32, i32) {
    %0 = arith.index_cast %arg1 : i32 to index
    %1 = memref.load %arg3[%0] : memref<1xi32, #tpu.memory_space<smem>>
    %c0_i32 = arith.constant 0 : i32
    %c0_i32_0 = arith.constant 0 : i32
    return %arg0, %1, %c0_i32 : i32, i32, i32
  }
  func.func @transform_2(%arg0: i32, %arg1: i32, %arg2: memref<1xi32, #tpu.memory_space<smem>>, %arg3: memref<1xi32, #tpu.memory_space<smem>>) -> (i32, i32, i32) {
    %c0_i32 = arith.constant 0 : i32
    %c0_i32_0 = arith.constant 0 : i32
    %c0_i32_1 = arith.constant 0 : i32
    return %arg0, %c0_i32, %c0_i32_0 : i32, i32, i32
  }
}

</mosaic_0001>

<bundles_post_ra>
// kernel: tpu_custom_call.1
= control target key start
LH: loop header
LB: loop body
LE: loop exit
PB: predicated region body
PF: predicated region fallthrough
CT: control target
= control target key end

     0   :  { %s1124_s0 = inlined_call_operand.<no memory space> [shape: s32[1], index: 0, kind: input, shape index: {}]   ;;  %s1125_s1 = inlined_call_operand.<no memory space> [shape: s32[1], index: 1, kind: input, shape index: {}]   ;;  %s1126_s2 = inlined_call_operand.hbm [shape: f32[2,8,34], index: 2, kind: input, shape index: {}]   ;;  %s1127_s3 = inlined_call_operand.hbm [shape: f32[2,8,34], index: 3, kind: input, shape index: {}]   ;;  %s1128_s4 = inlined_call_operand.hbm [shape: f32[2,8,128], index: 4, kind: output, shape index: {}]  }
   0x1   :  { %9 = sst [smem:[#allocation4]] %s1124_s0 }
   0x2   :  { %10 = sst [smem:[#allocation5]] %s1125_s1 }
   0x3   :  { %11 = vsyncpa [#allocation7], 0 }
   0x4   :  { %13 = vsyncpa [#allocation7 + $0x1], 0 }
   0x5   :  { %14 = vsyncpa [#allocation10], 0 }
   0x6   :  { %16 = vsyncpa [#allocation10 + $0x1], 0 }
   0x7   :  { %17 = vsyncpa [#allocation8], 0 }
   0x8   :  { %19 = vsyncpa [#allocation8 + $0x1], 0  ;;  %s837_s19 = smov 0   ;;  %s839_s20 = smov 0  }
   0x9   :  { %s841_s21 = smov 0   ;;  %s843_s22 = smov 0  }
   0xa   :  { %s845_s23 = smov 0   ;;  %s847_s0 = smov 0  }
   0xb   :  { %s849_s24 = smov 0   ;;  %s851_s1 = smov 0  }
   0xc   :  { %s853_s25 = smov 0   ;;  %s855_s26 = smov 0  }
   0xd   :  { %s857_s27 = smov 0   ;;  %s859_s28 = smov 0  }
   0xe LB: > { %1139 = sst [smem:[#allocation15_spill]] %s763_s21  ;;  %s465_s29 = sadd.s32 4294967295, %s799_s28   ;;  %s799_s28 = sphi %s859_s28, %s25_s28   ;;  %s795_s27 = sphi %s857_s27, %s1179_s27   ;;  %s791_s26 = sphi %s855_s26, %s1178_s26   ;;  %s787_s25 = sphi %s853_s25, %s1169_s25   ;;  %s783_s1 = sphi %s851_s1, %s1177_s1   ;;  %s779_s24 = sphi %s849_s24, %s1176_s24   ;;  %s775_s0 = sphi %s847_s0, %s1175_s0   ;;  %s771_s23 = sphi %s845_s23, %s1174_s23   ;;  %s767_s22 = sphi %s843_s22, %s1173_s22   ;;  %s763_s21 = sphi %s841_s21, %s1167_s21   ;;  %s759_s20 = sphi %s839_s20, %s1172_s20   ;;  %s755_s19 = sphi %s837_s19, %s1171_s19  }
   0xf   : > { %1140 = sst [smem:[#allocation16_spill]] %s787_s25  ;;  %s466_s30 = sadd.s32 4294967294, %s799_s28  }
  0x10   : > { %s37_s5 = sadd.s32 1, %s795_s27  ;;  %s41_s6 = sld [smem:[#allocation4]] }
  0x11   : > { %p39_p0 = scmp.ge.s32.totalorder %s37_s5, 2  ;;  %s48_s7 = sadd.s32 1, %s787_s25 }
  0x12   : > { %p55_p1 = scmp.ne.s32.totalorder %s787_s25, %s783_s1  ;;  %p1131_p2 = scmp.eq.s32.totalorder %s799_s28, 0 }
  0x13   : > { %s1181_s5 = smov (%p39_p0, %s37_s5), 0  ;;  %p61_p4 = scmp.ne.s32.totalorder %s783_s1, %s779_s24 }
  0x14   : > { %1141 = sst [smem:[#allocation17_spill]] %s1181_s5  ;;  %p906_p3 = por %p1131_p2, %p55_p1 }
  0x15   : > { %s43_s9 = ssub.s32 %s795_s27, %s1181_s5  ;;  %p913_p5 = scmp.eq.s32.totalorder %s465_s29, 0 }
  0x16   : > { %s917_s11 = sld [smem:[#allocation5]]  ;;  %p925_p7 = scmp.eq.s32.totalorder %s43_s9, 0 }
  0x17   : > { %s1143_s10 = scalar_select %p913_p5, 1, 0 }
  0x18   : > { %p921_p6 = por %p913_p5, %p61_p4  ;;  %s104_s14 = sadd.s32 1, %s763_s21 }
  0x19   : > { %s1145_s13 = scalar_select %p925_p7, 1, 0 }
  0x1a   : > { %s1144_s12 = scalar_select %p921_p6, 1, 0 }
  0x1b   : > { %p114_p8 = scmp.ne.s32.totalorder %s763_s21, %s759_s20  ;;  %p115_p9 = scmp.eq.s32.totalorder %s465_s29, 1 }
  0x1c   : > { %s935_s15 = scalar_select %p925_p7, %s787_s25, %s48_s7  }
  0x1d   : > { %s940_s16 = scalar_select %p925_p7, %s763_s21, %s104_s14  }
  0x1e   : > { %1146 = sst [smem:[#allocation18_spill]] %s935_s15  ;;  %p120_p10 = scmp.ne.s32.totalorder %s759_s20, %s755_s19 }
  0x1f   : > { %1147 = sst [smem:[#allocation19_spill]] %s940_s16  ;;  %p944_p11 = por %p115_p9, %p114_p8 }
  0x20   : > { %p121_p12 = scmp.eq.s32.totalorder %s466_s30, 1  ;;  %p1132_p0 = scmp.lt.s32.totalorder %s799_s28, 2 }
  0x21   : > { %s1148_s17 = scalar_select %p944_p11, 1, 0 }
  0x22   : > { %s141_s18 = sand.u32 1, %s787_s25   ;;  %p951_p1 = por %p121_p12, %p120_p10 }
  0x23   : > { %s469_s7 = sshll.u32 %s141_s18, 3  ;;  %s150_s9 = sadd.s32 %s795_s27, %s41_s6 }
  0x24   : > { %s1149_s24 = scalar_select %p951_p1, 1, 0 }
  0x25   : > { %s470_s14 = sshll.u32 %s150_s9, 7  ;;  %s145_s16 = scalar_lea.vmem [#allocation6], %s469_s7 }
  0x26   : > { %s959_s15 = scalar_lea.hbm %s1126_s2, %s470_s14  ;;  %s154_s30 = sshll.u32 %s145_s16, 4  ;;  %s961_s30 = int_to_ptr.vmem [resolvable:$true] %s154_s30 }
  0x27   : > { %p967_p4 = pnand %p1132_p0, %p906_p3  ;;  %s142_s6 = scalar_lea.sflag [#allocation7], %s141_s18 }
  0x28   : > { %s611_s5 = scalar_lea.hbm %s959_s15, 128  ;;  %s616_s9 = scalar_lea.hbm %s1126_s2, 256 }
  0x29   : > { %p612_p10 = scmp.ne.s32.totalorder %s959_s15, %s611_s5  ;;  %p613_p12 = pneg %p967_p4 }
  0x2a   : > { %p617_p3 = scmp.lt.s32.totalorder %s959_s15, %s1126_s2  ;;  %p618_p0 = scmp.lt.s32.totalorder %s616_s9, %s611_s5 }
  0x2b   : > { %p614_p13 = pnand %p613_p12, %p612_p10 }
  0x2c   : > { %p619_p1 = por %p618_p0, %p617_p3 }
  0x2d   : > { %p615_p2 = pneg %p614_p13 }
  0x2f   : > { %p620_p11 = pnand %p619_p1, %p615_p2 }
  0x31   : > { %623 = shalt.err (!%p620_p11)
}
  0x32   : > { %s624_s18 = scalar_lea.vmem %s961_s30, 128  ;;  %s801_s29 = smov [#allocation6]  }
  0x33   : > { %p625_p8 = scmp.ne.s32.totalorder %s961_s30, %s624_s18  ;;  %s629_s21 = sshll.u32 %s801_s29, 4  ;;  %s630_s21 = int_to_ptr.vmem [resolvable:$false] %s629_s21 }
  0x34   : > { %s631_s7 = scalar_lea.vmem %s630_s21, 256  ;;  %p632_p13 = scmp.lt.s32.totalorder %s961_s30, %s630_s21 }
  0x35   : > { %p627_p9 = pnand %p625_p8, %p613_p12  ;;  %p633_p6 = scmp.lt.s32.totalorder %s631_s7, %s624_s18 }
  0x37   : > { %p628_p10 = pneg %p627_p9  ;;  %p634_p5 = por %p633_p6, %p632_p13 }
  0x39   : > { %p635_p7 = pnand %p634_p5, %p628_p10 }
  0x3b   : > { %638 = shalt.err (!%p635_p7)
}
  0x3c   : > { %501 = dma.hbm_to_vmem [thread:$0]  (!%p967_p4), %s959_s15, 128, %s961_s30, %s142_s6  }
  0x3d   : > { %p1151_p2 = scmp.lt.s32.totalorder %s799_s28, 3  ;;  %p1152_p5 = scmp.ge.s32.totalorder %s799_s28, 1 }
  0x3e   : > { %s78_s25 = sadd.s32 1, %s775_s0  ;;  %p85_p7 = scmp.ne.s32.totalorder %s775_s0, %s771_s23 }
  0x3f   : > { %p995_p6 = pnand %p1152_p5, %p1151_p2  ;;  %p1154_p11 = scmp.ne.s32.totalorder %s1145_s13, 0 }
  0x40   : > { %p1155_p0 = scmp.eq.s32.totalorder %s799_s28, 0  ;;  %p91_p8 = scmp.ne.s32.totalorder %s771_s23, %s767_s22 }
  0x41   : > { %s1153_s21 = scalar_select %p995_p6, 1, 0 }
  0x42   : > { %s1005_s5 = scalar_select %p1154_p11, %s775_s0, %s78_s25  }
  0x43   : > { %p87_p1 = por %p85_p7, %p1155_p0  ;;  %s161_s16 = sand.u32 1, %s775_s0  }
  0x44   : > { %s170_s9 = sadd.s32 %s795_s27, %s917_s11  ;;  %p1156_p9 = scmp.ne.s32.totalorder %s1143_s10, 0 }
  0x45   : > { %s471_s15 = sshll.u32 %s161_s16, 3  ;;  %s472_s30 = sshll.u32 %s170_s9, 7 }
  0x46   : > { %p1016_p12 = por %p91_p8, %p1156_p9  ;;  %s1023_s18 = scalar_lea.hbm %s1127_s3, %s472_s30 }
  0x47   : > { %s165_s13 = scalar_lea.vmem [#allocation9], %s471_s15  ;;  %p1158_p4 = scmp.lt.s32.totalorder %s799_s28, 2 }
  0x48   : > { %s1157_s8 = scalar_select %p1016_p12, 1, 0 }
  0x49   : > { %s174_s29 = sshll.u32 %s165_s13, 4  ;;  %p1027_p3 = pnand %p1158_p4, %p87_p1  ;;  %s175_s29 = int_to_ptr.vmem [resolvable:$true] %s174_s29 }
  0x4a   : > { %s162_s10 = scalar_lea.sflag [#allocation10], %s161_s16  ;;  %s639_s11 = scalar_lea.hbm %s1023_s18, 128 }
  0x4b   : > { %p640_p10 = scmp.ne.s32.totalorder %s1023_s18, %s639_s11  ;;  %p641_p13 = pneg %p1027_p3 }
  0x4c   : > { %s644_s9 = scalar_lea.hbm %s1127_s3, 256  ;;  %p645_p7 = scmp.lt.s32.totalorder %s1023_s18, %s1127_s3 }
  0x4d   : > { %p642_p2 = pnand %p641_p13, %p640_p10  ;;  %p646_p11 = scmp.lt.s32.totalorder %s644_s9, %s639_s11 }
  0x4f   : > { %p643_p5 = pneg %p642_p2  ;;  %p647_p0 = por %p646_p11, %p645_p7 }
  0x51   : > { %p648_p1 = pnand %p647_p0, %p643_p5 }
  0x53   : > { %651 = shalt.err (!%p648_p1)
}
  0x54   : > { %s652_s6 = scalar_lea.vmem %s175_s29, 128  ;;  %s802_s16 = smov [#allocation9]  }
  0x55   : > { %p653_p8 = scmp.ne.s32.totalorder %s175_s29, %s652_s6  ;;  %s657_s14 = sshll.u32 %s802_s16, 4  ;;  %s658_s14 = int_to_ptr.vmem [resolvable:$false] %s657_s14 }
  0x56   : > { %s659_s13 = scalar_lea.vmem %s658_s14, 256  ;;  %p660_p10 = scmp.lt.s32.totalorder %s175_s29, %s658_s14 }
  0x57   : > { %p655_p9 = pnand %p653_p8, %p641_p13  ;;  %p661_p2 = scmp.lt.s32.totalorder %s659_s13, %s652_s6 }
  0x59   : > { %p656_p4 = pneg %p655_p9  ;;  %p662_p12 = por %p661_p2, %p660_p10 }
  0x5b   : > { %p663_p6 = pnand %p662_p12, %p656_p4 }
  0x5d   : > { %666 = shalt.err (!%p663_p6)
}
  0x5e   : > { %504 = dma.hbm_to_vmem [thread:$0]  (!%p1027_p3), %s1023_s18, 128, %s175_s29, %s162_s10  }
  0x5f   : > { %p1160_p5 = scmp.ne.s32.totalorder %s1153_s21, 0 }
  0x60   : > { %s185_s11 = sand.u32 (!%p1160_p5), 1, %s783_s1   ;;  %p1161_p13 = scmp.ne.s32.totalorder (!%p1160_p5), %s1144_s12, 0 }
  0x61   : > { %183 = sbr.rel (%p1160_p5) target bundleno = 563 (0x233), region = 28  ;;  %s474_s7 = sshll.u32 (!%p1160_p5), %s185_s11, 3 }
  0x62   : > { %s186_s25 = scalar_lea.sflag (!%p1160_p5), [#allocation7], %s185_s11  ;;  %s189_s9 = scalar_lea.vmem (!%p1160_p5), [#allocation6], %s474_s7 }
  0x66   : > { %742 = dma.done.wait (%p1161_p13), %s186_s25, 128  }
  0x67   : > { %744 = vsyncadd (%p1161_p13), %s186_s25, 4294967168  ;;  %s194_s15 = sand.u32 1, %s771_s23   ;;  %p1162_p6 = scmp.ne.s32.totalorder %s1157_s8, 0 }
  0x68   : > { %s475_s22 = sshll.u32 %s194_s15, 3  ;;  %s195_s30 = scalar_lea.sflag [#allocation10], %s194_s15 }
  0x69   : > { %s198_s18 = scalar_lea.vmem [#allocation9], %s475_s22 }
  0x6a   : > { %746 = dma.done.wait (%p1162_p6), %s195_s30, 128  }
  0x6b   : > { %748 = vsyncadd (%p1162_p6), %s195_s30, 4294967168  ;;  %v803_v0 = vmov 0.0   ;;  %vm804_vm0 = vmmov 0   ;;  %vm234_vm1 = vcmask 277504   ;;  %v233_v1 = vld [vmem:[%s198_s18] sm:$0xff]  ;;  %v232_v2 = vld [vmem:[%s189_s9] sm:$0xff] }
  0x6c   : > { %485 = vmatprep.subr.mxu0 %v803_v0  ;;  %487 = vmatprep.mubr.msk.f32.mxu0 %vm804_vm0, %v803_v0  ;;  %vm230_vm2 = vcmask 57344   ;;  %s314_s12 = sld [smem:[#allocation4]]  ;;  %vm319_vm3 = vcmask 64512   ;;  %s221_s29 = sand.u32 1, %s759_s20  }
  0x6d   : > { %486 = vmatpush3.xpose.msk.msra.mxu0 %vm234_vm1, %v233_v1  ;;  %231 = vst.msk [vmem:[#allocation2] sm:$0x1] %vm230_vm2, %v803_v0  ;;  %s315_s21 = sld [smem:[#allocation5]]  ;;  %s476_s10 = sshll.u32 %s221_s29, 3 }
  0x6e   : > { %s223_s6 = scalar_lea.vmem [#allocation11], %s476_s10  ;;  %s480_s14 = sshll.u32 %s791_s26, 7 }
  0x6f   : > { %s362_s16 = sshll.u32 %s223_s6, 4  ;;  %s360_s25 = scalar_lea.hbm %s1128_s4, %s480_s14  ;;  %s1062_s16 = int_to_ptr.vmem [resolvable:$true] %s362_s16 }
  0x70   : > { %488 = vmatmul.mubr.msk.f32.vlgmr.msra.gmra.mxu0 %vm234_vm1, %v232_v2  ;;  %s349_s9 = scalar_lea.sflag [#allocation8], %s221_s29  ;;  %s667_s15 = scalar_lea.vmem %s1062_s16, 128 }
  0x71   : > { %p668_p3 = scmp.ne.s32.totalorder %s1062_s16, %s667_s15  ;;  %p1163_p7 = scmp.ne.s32.totalorder %s1148_s17, 0 }
  0x72   : > { %s805_s22 = smov [#allocation11]  }
  0x73   : > { %p316_p12 = scmp.eq.s32.totalorder %s314_s12, %s315_s21  ;;  %p669_p11 = pnand %p668_p3, %p1163_p7 }
  0x74   : > { %v318_v16 = vld [vmem:[#allocation2] sm:$0x1]  ;;  %s671_s26 = sshll.u32 %s805_s22, 4  ;;  %s672_s26 = int_to_ptr.vmem [resolvable:$false] %s671_s26 }
  0x75   : > { %s317_s8 = scalar_select %p316_p12, 1.0, 2.0 }
  0x76   : > { %p670_p0 = pneg %p669_p11  ;;  %s673_s30 = scalar_lea.vmem %s672_s26, 256 }
  0x77   : > { %v327_v14 = vstv %s317_s8  ;;  %p674_p1 = scmp.lt.s32.totalorder %s1062_s16, %s672_s26  ;;  %p675_p8 = scmp.lt.s32.totalorder %s673_s30, %s667_s15 }
  0x79   : > { %p676_p9 = por %p675_p8, %p674_p1 }
  0x7b   : > { %p677_p4 = pnand %p676_p9, %p670_p0 }
 0x130   : > { %v307_v3 = vpop.f32.mrf.mxu0 }
 0x131   : > { %v311_v4 = vmin.f32 %v307_v3, 0.0 }
 0x132   : > { %v489_v5 = vpop.f32.mrf.mxu0 }
 0x133   : > { %v312_v6 = vmul.f32 1.442695, %v311_v4 }
 0x135   : > { %609 = vpow2.f32 %v312_v6 }
 0x142   : > { %v610_v7 = vpop.eup %609 }
 0x143   : > { %v320_v8 = vsel %vm319_vm3, %v610_v7, 0.0 }
 0x144   : > { %v321_v9 = vrot.slane %v320_v8, 4 }
 0x146   : > { %v322_v10 = vadd.f32 %v321_v9, %v320_v8 }
 0x148   : > { %v323_v11 = vrot.slane %v322_v10, 2 }
 0x14a   : > { %v324_v12 = vadd.f32 %v323_v11, %v322_v10 }
 0x14c   : > { %v325_v13 = vrot.slane %v324_v12, 1 }
 0x14e   : > { %v326_v15 = vadd.f32 %v325_v13, %v324_v12 }
 0x150   : > { %v328_v17 = vmul.f32 %v327_v14, %v326_v15 }
 0x152   : > { %v329_v18 = vadd.f32 %v328_v17, %v318_v16 }
 0x154   : > { %331 = vst.msk [vmem:[#allocation2] sm:$0x1] %vm230_vm2, %v329_v18 }
 0x15b   : > { %v335_v19 = vld [vmem:[#allocation2] sm:$0x1] }
 0x15c   : > { %v336_v20 = vsel %vm230_vm2, %v335_v19, 0.0 }
 0x15d   : > { %337 = vadd.xlane.f32.xlu0 %v336_v20 }
 0x1e6   : > { %v338_v21 = vpop.xlane.xlu0 %337 }
 0x1e7   : > { %v339_v22 = vrot.slane %v338_v21, 4 }
 0x1e9   : > { %v340_v23 = vadd.f32 %v339_v22, %v338_v21 }
 0x1eb   : > { %v341_v24 = vrot.slane %v340_v23, 2 }
 0x1ed   : > { %v342_v25 = vadd.f32 %v341_v24, %v340_v23 }
 0x1ef   : > { %v343_v26 = vrot.slane %v342_v25, 1 }
 0x1f1   : > { %v344_v27 = vadd.f32 %v343_v26, %v342_v25 }
 0x1f3   : > { %490 = vpush %v344_v27 }
 0x224   : > { %s491_s13 = spop %490 }
 0x225   : > { %v346_v28 = vstv %s491_s13 }
 0x226   : > { %347 = vst [vmem:[%s223_s6] sm:$0xff] %v346_v28 }
 0x227   : > { %680 = shalt.err (!%p677_p4)
}
 0x228   : > { %s681_s18 = scalar_lea.hbm %s360_s25, 128  ;;  %s685_s8 = scalar_lea.hbm %s1128_s4, 256 }
 0x229   : > { %p682_p10 = scmp.ne.s32.totalorder %s360_s25, %s681_s18  ;;  %p686_p13 = scmp.lt.s32.totalorder %s360_s25, %s1128_s4 }
 0x22a   : > { %p687_p6 = scmp.lt.s32.totalorder %s685_s8, %s681_s18 }
 0x22b   : > { %p683_p2 = pnand %p682_p10, %p1163_p7 }
 0x22c   : > { %p688_p12 = por %p687_p6, %p686_p13 }
 0x22d   : > { %p684_p5 = pneg %p683_p2 }
 0x22f   : > { %p689_p3 = pnand %p688_p12, %p684_p5 }
 0x231   : > { %692 = shalt.err (!%p689_p3)
}
 0x232   : > { %496 = dma.vmem_to_hbm [thread:$0]  (%p1163_p7), %s1062_s16, 128, %s360_s25, %s349_s9  }
 0x233 PF: > { %s374_s6 = sand.u32 1, %s755_s19   ;;  %p1164_p11 = scmp.ne.s32.totalorder %s1149_s24, 0 }
 0x234   : > { %p1165_p0 = scmp.ge.s32.totalorder %s799_s28, 2  ;;  %s375_s14 = scalar_lea.sflag [#allocation8], %s374_s6 }
 0x236   : > { %p506_p1 = pnand %p1165_p0, %p1164_p11 }
 0x238   : > { %p507_p8 = pneg %p506_p1 }
 0x23a   : > { %750 = dma.done.wait (%p507_p8), %s375_s14, 128  }
 0x23b   : > { %752 = vsyncadd (%p507_p8), %s375_s14, 4294967168  ;;  %s25_s28 = sadd.s32 1, %s799_s28   ;;  %s1166_s13 = sld [smem:[#allocation15_spill]] }
 0x23c   : > { %p22_p9 = scmp.ge.s32.totalorder %s25_s28, 4   ;;  %s1167_s21 = sld [smem:[#allocation19_spill]] }
 0x23d   : > { %s1168_s17 = sld [smem:[#allocation16_spill]]  ;;  %s1171_s19 = smov %s759_s20 }
 0x23e   : > { %s1169_s25 = sld [smem:[#allocation18_spill]]  ;;  %s1173_s22 = smov %s771_s23 }
 0x23f   : > { %s1170_s16 = sld [smem:[#allocation17_spill]]  ;;  %s1174_s23 = smov %s775_s0 }
 0x240   : > { %s1175_s0 = smov %s1005_s5  ;;  %s1176_s24 = smov %s783_s1 }
 0x241   : > { %s1172_s20 = smov %s1166_s13  ;;  %s1178_s26 = smov %s795_s27 }
 0x242   :  { %24 = sbr.rel (!%p22_p9) target bundleno = 14 (0xe), region = 94 }
 0x243   : > { %s1177_s1 = smov %s1168_s17 }
 0x245   : > { %s1179_s27 = smov %s1170_s16 }
 0x247   :  { %380 = vsyncpa [#allocation7], 1 }
 0x248   :  { %382 = vsyncpa [#allocation7 + $0x1], 1 }
 0x249   :  { %383 = vsyncpa [#allocation10], 1 }
 0x24a   :  { %385 = vsyncpa [#allocation10 + $0x1], 1 }
 0x24b   :  { %386 = vsyncpa [#allocation8], 1 }
 0x24c   :  { %388 = vsyncpa [#allocation8 + $0x1], 1 }

</bundles_post_ra>
